<compile_context>
chip_gen: v5e
topology: v5e:2x2
jax: 0.10.0
libtpu: 0.0.40
codegen_flags: <defaults>
</compile_context>

<pallas_src>
import functools

import jax
import jax.numpy as jnp
from jax.experimental import pallas as pl
from jax.experimental.pallas import tpu as pltpu


# ------------------------------ Pallas kernel ------------------------------ #

def _basic_block_kernel(*refs, stride, ksize, lout, has_down):
    """Fused BasicBlock forward for ONE batch element.

    conv1(k=3, stride, pad=1) + bn1 + relu  -> bf16 VMEM scratch (zero halo)
    conv2(k=3, 1, pad=1) + bn2 + residual   -> relu -> out (bf16)

    conv1's stride is handled by a stride-phase decomposition of the padded
    input, done cheaply in the wrapper:
        padded row (l*stride + t)  ==  phase[t % stride][l + t // stride]
    so every tap is a contiguous row-slice of one phase array.
    """
    if has_down:
        (xph_ref, w1_ref, b1_ref, w2_ref, b2_ref,
         wd_ref, bd_ref, o_ref, h_ref) = refs
    else:
        xph_ref, w1_ref, b1_ref, w2_ref, b2_ref, o_ref, h_ref = refs
        wd_ref = bd_ref = None

    cp = w1_ref.shape[-1]                                   # padded planes

    # ---- conv1 + bn1 + relu -> bf16 scratch with 1-row zero halo ----------
    acc = jnp.zeros((lout, cp), jnp.float32)
    for t in range(ksize):
        xt = xph_ref[0, t % stride, pl.ds(t // stride, lout), :]
        acc = acc + jnp.dot(xt, w1_ref[t], preferred_element_type=jnp.float32)
    h = jnp.maximum(acc + b1_ref[...], 0.0)

    zero_row = jnp.zeros((1, cp), h_ref.dtype)
    h_ref[pl.ds(0, 1), :] = zero_row                        # left pad row
    h_ref[pl.ds(lout + 1, 1), :] = zero_row                 # right pad row
    h_ref[pl.ds(1, lout), :] = h.astype(h_ref.dtype)

    # ---- conv2 + bn2 -------------------------------------------------------
    acc2 = jnp.zeros((lout, cp), jnp.float32)
    for t in range(ksize):
        ht = h_ref[pl.ds(t, lout), :]
        acc2 = acc2 + jnp.dot(ht, w2_ref[t], preferred_element_type=jnp.float32)
    acc2 = acc2 + b2_ref[...]

    # ---- residual (identity or 1x1-conv+bn downsample) + relu --------------
    # Original row l*stride sits at padded row l*stride + 1, i.e.
    # phase (1 % stride), position l + 1 // stride.
    xres = xph_ref[0, 1 % stride, pl.ds(1 // stride, lout), :]
    if has_down:
        acc2 = (acc2 + jnp.dot(xres, wd_ref[...],
                               preferred_element_type=jnp.float32)
                + bd_ref[...])
    else:
        acc2 = acc2 + xres.astype(jnp.float32)

    o_ref[0] = jnp.maximum(acc2, 0.0).astype(o_ref.dtype)


# ------------------------------ kernel wrapper ------------------------------ #

def _block_call(xph, blk, lout):
    """One pallas_call for a whole BasicBlock. xph: (N, stride, Lph, Ci) bf16."""
    has_down = 'wd' in blk
    n, s, lph, ci = xph.shape
    ksize = blk['w1'].shape[0]
    cp = blk['w1'].shape[-1]

    operands = [xph, blk['w1'], blk['b1'], blk['w2'], blk['b2']]
    in_specs = [
        pl.BlockSpec((1, s, lph, ci), lambda i: (i, 0, 0, 0)),
        pl.BlockSpec((ksize, ci, cp), lambda i: (0, 0, 0)),
        pl.BlockSpec((1, cp), lambda i: (0, 0)),
        pl.BlockSpec((ksize, cp, cp), lambda i: (0, 0, 0)),
        pl.BlockSpec((1, cp), lambda i: (0, 0)),
    ]
    if has_down:
        operands += [blk['wd'], blk['bd']]
        in_specs += [
            pl.BlockSpec((ci, cp), lambda i: (0, 0)),
            pl.BlockSpec((1, cp), lambda i: (0, 0)),
        ]

    kernel = functools.partial(_basic_block_kernel, stride=s, ksize=ksize,
                               lout=lout, has_down=has_down)
    return pl.pallas_call(
        kernel,
        out_shape=jax.ShapeDtypeStruct((n, lout, cp), jnp.bfloat16),
        grid_spec=pltpu.PrefetchScalarGridSpec(
            num_scalar_prefetch=0,
            grid=(n,),                                   # one sequence per step
            in_specs=in_specs,
            out_specs=pl.BlockSpec((1, lout, cp), lambda i: (i, 0, 0)),
            scratch_shapes=[pltpu.VMEM((lout + 2, cp), jnp.bfloat16)],
        ),
        compiler_params=pltpu.CompilerParams(
            dimension_semantics=("parallel",)),          # megacore over batch
    )(*operands)


# ------------------------------- model glue --------------------------------- #

def _round_up(v, m):
    return ((v + m - 1) // m) * m


def _bn_scale_shift(c, eps=1e-5):
    # TODO(synk): placeholder inference BN stats (mean=0, var=1, gamma=1, beta=0).
    gamma = jnp.ones((c,), jnp.float32)
    beta = jnp.zeros((c,), jnp.float32)
    mean = jnp.zeros((c,), jnp.float32)
    var = jnp.ones((c,), jnp.float32)
    scale = gamma / jnp.sqrt(var + eps)
    shift = beta - mean * scale
    return scale, shift


def _kaiming_conv(key, cin, cout, k):
    std = (2.0 / (cout * k)) ** 0.5           # kaiming_normal_, fan_out, relu
    return jax.random.normal(key, (cout, cin, k), jnp.float32) * std


def make_basic_block(key, inplanes, planes, stride=1):
    """Raw f32 parameters (PyTorch layout) for one BasicBlock."""
    k1, k2, kd = jax.random.split(key, 3)
    raw = {'stride': stride,
           'w1': _kaiming_conv(k1, inplanes, planes, 3),
           'w2': _kaiming_conv(k2, planes, planes, 3)}
    if stride != 1 or inplanes != planes:
        raw['wd'] = _kaiming_conv(kd, inplanes, planes, 1)   # 1x1 downsample
    return raw


def _fold_pad(w, cin_pad, cout_pad):
    """(Cout, Cin, K) f32 conv weight -> (K, Cin_pad, Cout_pad) bf16 with BN
    scale folded in, plus the (1, Cout_pad) f32 BN shift."""
    cout, cin, _ = w.shape
    scale, shift = _bn_scale_shift(cout)
    wf = jnp.transpose(w * scale[:, None, None], (2, 1, 0))  # (K, Cin, Cout)
    wf = jnp.pad(wf, ((0, 0), (0, cin_pad - cin), (0, cout_pad - cout)))
    b = jnp.pad(shift, (0, cout_pad - cout)).reshape(1, cout_pad)
    return wf.astype(jnp.bfloat16), b.astype(jnp.float32)


def prep_block_params(raw):
    """Fold BN, pad channels to multiples of 128, cast weights to bf16."""
    planes, inplanes, _ = raw['w1'].shape
    ci_pad = _round_up(inplanes, 128)
    cp_pad = _round_up(planes, 128)
    blk = {'stride': raw['stride'], 'planes': planes}
    blk['w1'], blk['b1'] = _fold_pad(raw['w1'], ci_pad, cp_pad)
    blk['w2'], blk['b2'] = _fold_pad(raw['w2'], cp_pad, cp_pad)
    if 'wd' in raw:
        wd, bd = _fold_pad(raw['wd'], ci_pad, cp_pad)        # (1, Ci, Cp)
        blk['wd'] = wd.reshape(ci_pad, cp_pad)
        blk['bd'] = bd
    return blk


def basic_block_forward(x_nlc, blk):
    """One fused Pallas call.  x_nlc: (N, L, Ci_pad) bf16 -> (N, Lout, Cp_pad) bf16."""
    n, length, _ = x_nlc.shape
    s = blk['stride']
    ksize = blk['w1'].shape[0]
    lout = (length + 2 - ksize) // s + 1
    lph = (ksize - 1) // s + lout

    xp = jnp.pad(x_nlc, ((0, 0), (1, 1), (0, 0)))            # pad=1 on L
    phases = []
    for p in range(s):
        ph = xp[:, p::s, :]
        if ph.shape[1] < lph:
            ph = jnp.pad(ph, ((0, 0), (0, lph - ph.shape[1]), (0, 0)))
        elif ph.shape[1] > lph:
            ph = ph[:, :lph, :]
        phases.append(ph)
    xph = jnp.stack(phases, axis=1)                          # (N, s, Lph, Ci)
    return _block_call(xph, blk, lout)


def run_blocks(x_ncl, blocks, out_planes):
    """Chain of BasicBlocks; PyTorch NCL f32 in, NCL f32 out."""
    x = jnp.transpose(x_ncl, (0, 2, 1))                      # (N, L, C)
    cin = x.shape[-1]
    ci_pad = _round_up(cin, 128)
    x = jnp.pad(x, ((0, 0), (0, 0), (0, ci_pad - cin))).astype(jnp.bfloat16)
    for blk in blocks:
        x = basic_block_forward(x, blk)
    x = x[..., :out_planes].astype(jnp.float32)
    return jnp.transpose(x, (0, 2, 1))                       # back to (N, C, L)


# ---------------------------- pure-JAX reference ---------------------------- #

def _conv1d_ref(x_ncl, w, stride, padding):
    return jax.lax.conv_general_dilated(
        x_ncl, w, window_strides=(stride,), padding=[(padding, padding)],
        dimension_numbers=('NCH', 'OIH', 'NCH'))


def _bn_ref(y):
    scale, shift = _bn_scale_shift(y.shape[1])
    return y * scale[None, :, None] + shift[None, :, None]


def basic_block_ref(x_ncl, raw):
    s = raw['stride']
    out = jax.nn.relu(_bn_ref(_conv1d_ref(x_ncl, raw['w1'], s, 1)))
    out = _bn_ref(_conv1d_ref(out, raw['w2'], 1, 1))
    if 'wd' in raw:
        identity = _bn_ref(_conv1d_ref(x_ncl, raw['wd'], s, 0))
    else:
        identity = x_ncl
    return jax.nn.relu(out + identity)


# ----------------------------------- main ----------------------------------- #

if __name__ == "__main__":
    key = jax.random.PRNGKey(0)
    kx, kb1, kb2 = jax.random.split(key, 3)

    # Small shapes (PyTorch NCL layout): batch=2, in_channels=16, L=32.
    x = jax.random.normal(kx, (2, 16, 32), jnp.float32)

    # One block with downsample (stride=2, channel change), one identity block.
    raw1 = make_basic_block(kb1, inplanes=16, planes=32, stride=2)
    raw2 = make_basic_block(kb2, inplanes=32, planes=32, stride=1)
    blk1, blk2 = prep_block_params(raw1), prep_block_params(raw2)

    fwd = jax.jit(lambda inp: run_blocks(inp, (blk1, blk2), out_planes=32))
    y = fwd(x)
    jax.block_until_ready(y)
    assert y.shape == (2, 32, 16), y.shape

    # Correctness vs. f32 XLA reference (bf16 weights/activations -> loose tol).
    y_ref = basic_block_ref(basic_block_ref(x, raw1), raw2)
    err = float(jnp.max(jnp.abs(y - y_ref)))
    assert err < 0.2, f"max abs error {err}"

    print("KERNEL_OK")
</pallas_src>

<mosaic_0001>
module attributes {stable_mosaic.version = 11 : i64} {
  func.func @_basic_block_kernel(%arg0: i32, %arg1: memref<1x2x17x128xbf16, #tpu.memory_space<vmem>>, %arg2: memref<3x128x128xbf16, #tpu.memory_space<vmem>>, %arg3: memref<1x128xf32, #tpu.memory_space<vmem>>, %arg4: memref<3x128x128xbf16, #tpu.memory_space<vmem>>, %arg5: memref<1x128xf32, #tpu.memory_space<vmem>>, %arg6: memref<128x128xbf16, #tpu.memory_space<vmem>>, %arg7: memref<1x128xf32, #tpu.memory_space<vmem>>, %arg8: memref<1x16x128xbf16, #tpu.memory_space<vmem>>, %arg9: memref<18x128xbf16, #tpu.memory_space<vmem>>) attributes {dimension_semantics = [#tpu.dimension_semantics<parallel>], iteration_bounds = array<i64: 2>, scalar_prefetch = 0 : i64, scratch_operands = 1 : i64, tpu.core_type = #tpu.core_type<tc>, window_params = [{transform_indices = @transform_0, window_bounds = array<i64: 1, 2, 17, 128>}, {pipeline_mode = #tpu.pipeline_mode<synchronous>, transform_indices = @transform_1, window_bounds = array<i64: 3, 128, 128>}, {pipeline_mode = #tpu.pipeline_mode<synchronous>, transform_indices = @transform_2, window_bounds = array<i64: 1, 128>}, {pipeline_mode = #tpu.pipeline_mode<synchronous>, transform_indices = @transform_3, window_bounds = array<i64: 3, 128, 128>}, {pipeline_mode = #tpu.pipeline_mode<synchronous>, transform_indices = @transform_4, window_bounds = array<i64: 1, 128>}, {pipeline_mode = #tpu.pipeline_mode<synchronous>, transform_indices = @transform_5, window_bounds = array<i64: 128, 128>}, {pipeline_mode = #tpu.pipeline_mode<synchronous>, transform_indices = @transform_6, window_bounds = array<i64: 1, 128>}, {transform_indices = @transform_7, window_bounds = array<i64: 1, 16, 128>}]} {
    %cst = arith.constant 0.000000e+00 : f32
    %0 = vector.broadcast %cst : f32 to vector<16x128xf32>
    %c0 = arith.constant 0 : index
    %c0_0 = arith.constant 0 : index
    %c0_1 = arith.constant 0 : index
    %c0_2 = arith.constant 0 : index
    %1 = vector.load %arg1[%c0, %c0_0, %c0_1, %c0_2] : memref<1x2x17x128xbf16, #tpu.memory_space<vmem>>, vector<1x1x16x128xbf16>
    %2 = vector.shape_cast %1 : vector<1x1x16x128xbf16> to vector<16x128xbf16>
    %c0_3 = arith.constant 0 : index
    %c0_4 = arith.constant 0 : index
    %c0_5 = arith.constant 0 : index
    %3 = vector.load %arg2[%c0_3, %c0_4, %c0_5] : memref<3x128x128xbf16, #tpu.memory_space<vmem>>, vector<1x128x128xbf16>
    %4 = vector.shape_cast %3 : vector<1x128x128xbf16> to vector<128x128xbf16>
    %cst_6 = arith.constant dense<0.000000e+00> : vector<16x128xf32>
    %5 = tpu.matmul %2, %4, %cst_6 {dimension_numbers = #tpu.dot_dimension_numbers<[1], [0], [0], [1], [0, 0, 1, 1], [], []>} : vector<16x128xbf16>, vector<128x128xbf16>, vector<16x128xf32> -> vector<16x128xf32>
    %6 = arith.addf %0, %5 : vector<16x128xf32>
    %c0_7 = arith.constant 0 : index
    %c1 = arith.constant 1 : index
    %c0_8 = arith.constant 0 : index
    %c0_9 = arith.constant 0 : index
    %7 = vector.load %arg1[%c0_7, %c1, %c0_8, %c0_9] : memref<1x2x17x128xbf16, #tpu.memory_space<vmem>>, vector<1x1x16x128xbf16>
    %8 = vector.shape_cast %7 : vector<1x1x16x128xbf16> to vector<16x128xbf16>
    %c1_10 = arith.constant 1 : index
    %c0_11 = arith.constant 0 : index
    %c0_12 = arith.constant 0 : index
    %9 = vector.load %arg2[%c1_10, %c0_11, %c0_12] : memref<3x128x128xbf16, #tpu.memory_space<vmem>>, vector<1x128x128xbf16>
    %10 = vector.shape_cast %9 : vector<1x128x128xbf16> to vector<128x128xbf16>
    %cst_13 = arith.constant dense<0.000000e+00> : vector<16x128xf32>
    %11 = tpu.matmul %8, %10, %cst_13 {dimension_numbers = #tpu.dot_dimension_numbers<[1], [0], [0], [1], [0, 0, 1, 1], [], []>} : vector<16x128xbf16>, vector<128x128xbf16>, vector<16x128xf32> -> vector<16x128xf32>
    %12 = arith.addf %6, %11 : vector<16x128xf32>
    %c0_14 = arith.constant 0 : index
    %c0_15 = arith.constant 0 : index
    %c1_16 = arith.constant 1 : index
    %c0_17 = arith.constant 0 : index
    %13 = vector.load %arg1[%c0_14, %c0_15, %c1_16, %c0_17] : memref<1x2x17x128xbf16, #tpu.memory_space<vmem>>, vector<1x1x16x128xbf16>
    %14 = vector.shape_cast %13 : vector<1x1x16x128xbf16> to vector<16x128xbf16>
    %c2 = arith.constant 2 : index
    %c0_18 = arith.constant 0 : index
    %c0_19 = arith.constant 0 : index
    %15 = vector.load %arg2[%c2, %c0_18, %c0_19] : memref<3x128x128xbf16, #tpu.memory_space<vmem>>, vector<1x128x128xbf16>
    %16 = vector.shape_cast %15 : vector<1x128x128xbf16> to vector<128x128xbf16>
    %cst_20 = arith.constant dense<0.000000e+00> : vector<16x128xf32>
    %17 = tpu.matmul %14, %16, %cst_20 {dimension_numbers = #tpu.dot_dimension_numbers<[1], [0], [0], [1], [0, 0, 1, 1], [], []>} : vector<16x128xbf16>, vector<128x128xbf16>, vector<16x128xf32> -> vector<16x128xf32>
    %18 = arith.addf %12, %17 : vector<16x128xf32>
    %c0_21 = arith.constant 0 : index
    %c0_22 = arith.constant 0 : index
    %19 = vector.load %arg3[%c0_21, %c0_22] : memref<1x128xf32, #tpu.memory_space<vmem>>, vector<1x128xf32>
    %20 = vector.broadcast %19 : vector<1x128xf32> to vector<16x128xf32>
    %21 = arith.addf %18, %20 : vector<16x128xf32>
    %cst_23 = arith.constant 0.000000e+00 : f32
    %22 = vector.broadcast %cst_23 : f32 to vector<16x128xf32>
    %23 = arith.maximumf %21, %22 : vector<16x128xf32>
    %cst_24 = arith.constant 0.000000e+00 : bf16
    %24 = vector.broadcast %cst_24 : bf16 to vector<1x128xbf16>
    %c0_25 = arith.constant 0 : index
    %c0_26 = arith.constant 0 : index
    %25 = vector.load %arg9[%c0_25, %c0_26] : memref<18x128xbf16, #tpu.memory_space<vmem>>, vector<1x128xbf16>
    tpu.vector_store %arg9[%c0_25, %c0_26], %24 {strides = array<i32>} : memref<18x128xbf16, #tpu.memory_space<vmem>>, vector<1x128xbf16>,
    %c17 = arith.constant 17 : index
    %c0_27 = arith.constant 0 : index
    %26 = vector.load %arg9[%c17, %c0_27] : memref<18x128xbf16, #tpu.memory_space<vmem>>, vector<1x128xbf16>
    tpu.vector_store %arg9[%c17, %c0_27], %24 {strides = array<i32>} : memref<18x128xbf16, #tpu.memory_space<vmem>>, vector<1x128xbf16>,
    %27 = arith.truncf %23 : vector<16x128xf32> to vector<16x128xbf16>
    %c1_28 = arith.constant 1 : index
    %c0_29 = arith.constant 0 : index
    %28 = vector.load %arg9[%c1_28, %c0_29] : memref<18x128xbf16, #tpu.memory_space<vmem>>, vector<16x128xbf16>
    tpu.vector_store %arg9[%c1_28, %c0_29], %27 {strides = array<i32>} : memref<18x128xbf16, #tpu.memory_space<vmem>>, vector<16x128xbf16>,
    %cst_30 = arith.constant 0.000000e+00 : f32
    %29 = vector.broadcast %cst_30 : f32 to vector<16x128xf32>
    %c0_31 = arith.constant 0 : index
    %c0_32 = arith.constant 0 : index
    %30 = vector.load %arg9[%c0_31, %c0_32] : memref<18x128xbf16, #tpu.memory_space<vmem>>, vector<16x128xbf16>
    %c0_33 = arith.constant 0 : index
    %c0_34 = arith.constant 0 : index
    %c0_35 = arith.constant 0 : index
    %31 = vector.load %arg4[%c0_33, %c0_34, %c0_35] : memref<3x128x128xbf16, #tpu.memory_space<vmem>>, vector<1x128x128xbf16>
    %32 = vector.shape_cast %31 : vector<1x128x128xbf16> to vector<128x128xbf16>
    %cst_36 = arith.constant dense<0.000000e+00> : vector<16x128xf32>
    %33 = tpu.matmul %30, %32, %cst_36 {dimension_numbers = #tpu.dot_dimension_numbers<[1], [0], [0], [1], [0, 0, 1, 1], [], []>} : vector<16x128xbf16>, vector<128x128xbf16>, vector<16x128xf32> -> vector<16x128xf32>
    %34 = arith.addf %29, %33 : vector<16x128xf32>
    %c1_37 = arith.constant 1 : index
    %c0_38 = arith.constant 0 : index
    %35 = vector.load %arg9[%c1_37, %c0_38] : memref<18x128xbf16, #tpu.memory_space<vmem>>, vector<16x128xbf16>
    %c1_39 = arith.constant 1 : index
    %c0_40 = arith.constant 0 : index
    %c0_41 = arith.constant 0 : index
    %36 = vector.load %arg4[%c1_39, %c0_40, %c0_41] : memref<3x128x128xbf16, #tpu.memory_space<vmem>>, vector<1x128x128xbf16>
    %37 = vector.shape_cast %36 : vector<1x128x128xbf16> to vector<128x128xbf16>
    %cst_42 = arith.constant dense<0.000000e+00> : vector<16x128xf32>
    %38 = tpu.matmul %35, %37, %cst_42 {dimension_numbers = #tpu.dot_dimension_numbers<[1], [0], [0], [1], [0, 0, 1, 1], [], []>} : vector<16x128xbf16>, vector<128x128xbf16>, vector<16x128xf32> -> vector<16x128xf32>
    %39 = arith.addf %34, %38 : vector<16x128xf32>
    %c2_43 = arith.constant 2 : index
    %c0_44 = arith.constant 0 : index
    %40 = vector.load %arg9[%c2_43, %c0_44] : memref<18x128xbf16, #tpu.memory_space<vmem>>, vector<16x128xbf16>
    %c2_45 = arith.constant 2 : index
    %c0_46 = arith.constant 0 : index
    %c0_47 = arith.constant 0 : index
    %41 = vector.load %arg4[%c2_45, %c0_46, %c0_47] : memref<3x128x128xbf16, #tpu.memory_space<vmem>>, vector<1x128x128xbf16>
    %42 = vector.shape_cast %41 : vector<1x128x128xbf16> to vector<128x128xbf16>
    %cst_48 = arith.constant dense<0.000000e+00> : vector<16x128xf32>
    %43 = tpu.matmul %40, %42, %cst_48 {dimension_numbers = #tpu.dot_dimension_numbers<[1], [0], [0], [1], [0, 0, 1, 1], [], []>} : vector<16x128xbf16>, vector<128x128xbf16>, vector<16x128xf32> -> vector<16x128xf32>
    %44 = arith.addf %39, %43 : vector<16x128xf32>
    %c0_49 = arith.constant 0 : index
    %c0_50 = arith.constant 0 : index
    %45 = vector.load %arg5[%c0_49, %c0_50] : memref<1x128xf32, #tpu.memory_space<vmem>>, vector<1x128xf32>
    %46 = vector.broadcast %45 : vector<1x128xf32> to vector<16x128xf32>
    %47 = arith.addf %44, %46 : vector<16x128xf32>
    %c0_51 = arith.constant 0 : index
    %c1_52 = arith.constant 1 : index
    %c0_53 = arith.constant 0 : index
    %c0_54 = arith.constant 0 : index
    %48 = vector.load %arg1[%c0_51, %c1_52, %c0_53, %c0_54] : memref<1x2x17x128xbf16, #tpu.memory_space<vmem>>, vector<1x1x16x128xbf16>
    %49 = vector.shape_cast %48 : vector<1x1x16x128xbf16> to vector<16x128xbf16>
    %c0_55 = arith.constant 0 : index
    %c0_56 = arith.constant 0 : index
    %50 = vector.load %arg6[%c0_55, %c0_56] : memref<128x128xbf16, #tpu.memory_space<vmem>>, vector<128x128xbf16>
    %cst_57 = arith.constant dense<0.000000e+00> : vector<16x128xf32>
    %51 = tpu.matmul %49, %50, %cst_57 {dimension_numbers = #tpu.dot_dimension_numbers<[1], [0], [0], [1], [0, 0, 1, 1], [], []>} : vector<16x128xbf16>, vector<128x128xbf16>, vector<16x128xf32> -> vector<16x128xf32>
    %52 = arith.addf %47, %51 : vector<16x128xf32>
    %c0_58 = arith.constant 0 : index
    %c0_59 = arith.constant 0 : index
    %53 = vector.load %arg7[%c0_58, %c0_59] : memref<1x128xf32, #tpu.memory_space<vmem>>, vector<1x128xf32>
    %54 = vector.broadcast %53 : vector<1x128xf32> to vector<16x128xf32>
    %55 = arith.addf %52, %54 : vector<16x128xf32>
    %cst_60 = arith.constant 0.000000e+00 : f32
    %56 = vector.broadcast %cst_60 : f32 to vector<16x128xf32>
    %57 = arith.maximumf %55, %56 : vector<16x128xf32>
    %58 = arith.truncf %57 : vector<16x128xf32> to vector<16x128xbf16>
    %c0_61 = arith.constant 0 : index
    %c0_62 = arith.constant 0 : index
    %c0_63 = arith.constant 0 : index
    %59 = vector.load %arg8[%c0_61, %c0_62, %c0_63] : memref<1x16x128xbf16, #tpu.memory_space<vmem>>, vector<1x16x128xbf16>
    %60 = vector.shape_cast %59 : vector<1x16x128xbf16> to vector<16x128xbf16>
    %61 = vector.shape_cast %58 : vector<16x128xbf16> to vector<1x16x128xbf16>
    tpu.vector_store %arg8[%c0_61, %c0_62, %c0_63], %61 {strides = array<i32>} : memref<1x16x128xbf16, #tpu.memory_space<vmem>>, vector<1x16x128xbf16>,
    return
  }
  func.func @transform_0(%arg0: i32) -> (i32, i32, i32, i32) {
    %c0_i32 = arith.constant 0 : i32
    %c0_i32_0 = arith.constant 0 : i32
    %c0_i32_1 = arith.constant 0 : i32
    %c0_i32_2 = arith.constant 0 : i32
    return %arg0, %c0_i32, %c0_i32_0, %c0_i32_1 : i32, i32, i32, i32
  }
  func.func @transform_1(%arg0: i32) -> (i32, i32, i32) {
    %c0_i32 = arith.constant 0 : i32
    %c0_i32_0 = arith.constant 0 : i32
    %c0_i32_1 = arith.constant 0 : i32
    %c0_i32_2 = arith.constant 0 : i32
    return %c0_i32, %c0_i32_0, %c0_i32_1 : i32, i32, i32
  }
  func.func @transform_2(%arg0: i32) -> (i32, i32) {
    %c0_i32 = arith.constant 0 : i32
    %c0_i32_0 = arith.constant 0 : i32
    %c0_i32_1 = arith.constant 0 : i32
    return %c0_i32, %c0_i32_0 : i32, i32
  }
  func.func @transform_3(%arg0: i32) -> (i32, i32, i32) {
    %c0_i32 = arith.constant 0 : i32
    %c0_i32_0 = arith.constant 0 : i32
    %c0_i32_1 = arith.constant 0 : i32
    %c0_i32_2 = arith.constant 0 : i32
    return %c0_i32, %c0_i32_0, %c0_i32_1 : i32, i32, i32
  }
  func.func @transform_4(%arg0: i32) -> (i32, i32) {
    %c0_i32 = arith.constant 0 : i32
    %c0_i32_0 = arith.constant 0 : i32
    %c0_i32_1 = arith.constant 0 : i32
    return %c0_i32, %c0_i32_0 : i32, i32
  }
  func.func @transform_5(%arg0: i32) -> (i32, i32) {
    %c0_i32 = arith.constant 0 : i32
    %c0_i32_0 = arith.constant 0 : i32
    %c0_i32_1 = arith.constant 0 : i32
    return %c0_i32, %c0_i32_0 : i32, i32
  }
  func.func @transform_6(%arg0: i32) -> (i32, i32) {
    %c0_i32 = arith.constant 0 : i32
    %c0_i32_0 = arith.constant 0 : i32
    %c0_i32_1 = arith.constant 0 : i32
    return %c0_i32, %c0_i32_0 : i32, i32
  }
  func.func @transform_7(%arg0: i32) -> (i32, i32, i32) {
    %c0_i32 = arith.constant 0 : i32
    %c0_i32_0 = arith.constant 0 : i32
    %c0_i32_1 = arith.constant 0 : i32
    return %arg0, %c0_i32, %c0_i32_0 : i32, i32, i32
  }
}

module attributes {stable_mosaic.version = 11 : i64} {
  func.func @_basic_block_kernel(%arg0: i32, %arg1: memref<1x1x18x128xbf16, #tpu.memory_space<vmem>>, %arg2: memref<3x128x128xbf16, #tpu.memory_space<vmem>>, %arg3: memref<1x128xf32, #tpu.memory_space<vmem>>, %arg4: memref<3x128x128xbf16, #tpu.memory_space<vmem>>, %arg5: memref<1x128xf32, #tpu.memory_space<vmem>>, %arg6: memref<1x16x128xbf16, #tpu.memory_space<vmem>>, %arg7: memref<18x128xbf16, #tpu.memory_space<vmem>>) attributes {dimension_semantics = [#tpu.dimension_semantics<parallel>], iteration_bounds = array<i64: 2>, scalar_prefetch = 0 : i64, scratch_operands = 1 : i64, tpu.core_type = #tpu.core_type<tc>, window_params = [{transform_indices = @transform_0, window_bounds = array<i64: 1, 1, 18, 128>}, {pipeline_mode = #tpu.pipeline_mode<synchronous>, transform_indices = @transform_1, window_bounds = array<i64: 3, 128, 128>}, {pipeline_mode = #tpu.pipeline_mode<synchronous>, transform_indices = @transform_2, window_bounds = array<i64: 1, 128>}, {pipeline_mode = #tpu.pipeline_mode<synchronous>, transform_indices = @transform_3, window_bounds = array<i64: 3, 128, 128>}, {pipeline_mode = #tpu.pipeline_mode<synchronous>, transform_indices = @transform_4, window_bounds = array<i64: 1, 128>}, {transform_indices = @transform_5, window_bounds = array<i64: 1, 16, 128>}]} {
    %cst = arith.constant 0.000000e+00 : f32
    %0 = vector.broadcast %cst : f32 to vector<16x128xf32>
    %c0 = arith.constant 0 : index
    %c0_0 = arith.constant 0 : index
    %c0_1 = arith.constant 0 : index
    %c0_2 = arith.constant 0 : index
    %1 = vector.load %arg1[%c0, %c0_0, %c0_1, %c0_2] : memref<1x1x18x128xbf16, #tpu.memory_space<vmem>>, vector<1x1x16x128xbf16>
    %2 = vector.shape_cast %1 : vector<1x1x16x128xbf16> to vector<16x128xbf16>
    %c0_3 = arith.constant 0 : index
    %c0_4 = arith.constant 0 : index
    %c0_5 = arith.constant 0 : index
    %3 = vector.load %arg2[%c0_3, %c0_4, %c0_5] : memref<3x128x128xbf16, #tpu.memory_space<vmem>>, vector<1x128x128xbf16>
    %4 = vector.shape_cast %3 : vector<1x128x128xbf16> to vector<128x128xbf16>
    %cst_6 = arith.constant dense<0.000000e+00> : vector<16x128xf32>
    %5 = tpu.matmul %2, %4, %cst_6 {dimension_numbers = #tpu.dot_dimension_numbers<[1], [0], [0], [1], [0, 0, 1, 1], [], []>} : vector<16x128xbf16>, vector<128x128xbf16>, vector<16x128xf32> -> vector<16x128xf32>
    %6 = arith.addf %0, %5 : vector<16x128xf32>
    %c0_7 = arith.constant 0 : index
    %c0_8 = arith.constant 0 : index
    %c1 = arith.constant 1 : index
    %c0_9 = arith.constant 0 : index
    %7 = vector.load %arg1[%c0_7, %c0_8, %c1, %c0_9] : memref<1x1x18x128xbf16, #tpu.memory_space<vmem>>, vector<1x1x16x128xbf16>
    %8 = vector.shape_cast %7 : vector<1x1x16x128xbf16> to vector<16x128xbf16>
    %c1_10 = arith.constant 1 : index
    %c0_11 = arith.constant 0 : index
    %c0_12 = arith.constant 0 : index
    %9 = vector.load %arg2[%c1_10, %c0_11, %c0_12] : memref<3x128x128xbf16, #tpu.memory_space<vmem>>, vector<1x128x128xbf16>
    %10 = vector.shape_cast %9 : vector<1x128x128xbf16> to vector<128x128xbf16>
    %cst_13 = arith.constant dense<0.000000e+00> : vector<16x128xf32>
    %11 = tpu.matmul %8, %10, %cst_13 {dimension_numbers = #tpu.dot_dimension_numbers<[1], [0], [0], [1], [0, 0, 1, 1], [], []>} : vector<16x128xbf16>, vector<128x128xbf16>, vector<16x128xf32> -> vector<16x128xf32>
    %12 = arith.addf %6, %11 : vector<16x128xf32>
    %c0_14 = arith.constant 0 : index
    %c0_15 = arith.constant 0 : index
    %c2 = arith.constant 2 : index
    %c0_16 = arith.constant 0 : index
    %13 = vector.load %arg1[%c0_14, %c0_15, %c2, %c0_16] : memref<1x1x18x128xbf16, #tpu.memory_space<vmem>>, vector<1x1x16x128xbf16>
    %14 = vector.shape_cast %13 : vector<1x1x16x128xbf16> to vector<16x128xbf16>
    %c2_17 = arith.constant 2 : index
    %c0_18 = arith.constant 0 : index
    %c0_19 = arith.constant 0 : index
    %15 = vector.load %arg2[%c2_17, %c0_18, %c0_19] : memref<3x128x128xbf16, #tpu.memory_space<vmem>>, vector<1x128x128xbf16>
    %16 = vector.shape_cast %15 : vector<1x128x128xbf16> to vector<128x128xbf16>
    %cst_20 = arith.constant dense<0.000000e+00> : vector<16x128xf32>
    %17 = tpu.matmul %14, %16, %cst_20 {dimension_numbers = #tpu.dot_dimension_numbers<[1], [0], [0], [1], [0, 0, 1, 1], [], []>} : vector<16x128xbf16>, vector<128x128xbf16>, vector<16x128xf32> -> vector<16x128xf32>
    %18 = arith.addf %12, %17 : vector<16x128xf32>
    %c0_21 = arith.constant 0 : index
    %c0_22 = arith.constant 0 : index
    %19 = vector.load %arg3[%c0_21, %c0_22] : memref<1x128xf32, #tpu.memory_space<vmem>>, vector<1x128xf32>
    %20 = vector.broadcast %19 : vector<1x128xf32> to vector<16x128xf32>
    %21 = arith.addf %18, %20 : vector<16x128xf32>
    %cst_23 = arith.constant 0.000000e+00 : f32
    %22 = vector.broadcast %cst_23 : f32 to vector<16x128xf32>
    %23 = arith.maximumf %21, %22 : vector<16x128xf32>
    %cst_24 = arith.constant 0.000000e+00 : bf16
    %24 = vector.broadcast %cst_24 : bf16 to vector<1x128xbf16>
    %c0_25 = arith.constant 0 : index
    %c0_26 = arith.constant 0 : index
    %25 = vector.load %arg7[%c0_25, %c0_26] : memref<18x128xbf16, #tpu.memory_space<vmem>>, vector<1x128xbf16>
    tpu.vector_store %arg7[%c0_25, %c0_26], %24 {strides = array<i32>} : memref<18x128xbf16, #tpu.memory_space<vmem>>, vector<1x128xbf16>,
    %c17 = arith.constant 17 : index
    %c0_27 = arith.constant 0 : index
    %26 = vector.load %arg7[%c17, %c0_27] : memref<18x128xbf16, #tpu.memory_space<vmem>>, vector<1x128xbf16>
    tpu.vector_store %arg7[%c17, %c0_27], %24 {strides = array<i32>} : memref<18x128xbf16, #tpu.memory_space<vmem>>, vector<1x128xbf16>,
    %27 = arith.truncf %23 : vector<16x128xf32> to vector<16x128xbf16>
    %c1_28 = arith.constant 1 : index
    %c0_29 = arith.constant 0 : index
    %28 = vector.load %arg7[%c1_28, %c0_29] : memref<18x128xbf16, #tpu.memory_space<vmem>>, vector<16x128xbf16>
    tpu.vector_store %arg7[%c1_28, %c0_29], %27 {strides = array<i32>} : memref<18x128xbf16, #tpu.memory_space<vmem>>, vector<16x128xbf16>,
    %cst_30 = arith.constant 0.000000e+00 : f32
    %29 = vector.broadcast %cst_30 : f32 to vector<16x128xf32>
    %c0_31 = arith.constant 0 : index
    %c0_32 = arith.constant 0 : index
    %30 = vector.load %arg7[%c0_31, %c0_32] : memref<18x128xbf16, #tpu.memory_space<vmem>>, vector<16x128xbf16>
    %c0_33 = arith.constant 0 : index
    %c0_34 = arith.constant 0 : index
    %c0_35 = arith.constant 0 : index
    %31 = vector.load %arg4[%c0_33, %c0_34, %c0_35] : memref<3x128x128xbf16, #tpu.memory_space<vmem>>, vector<1x128x128xbf16>
    %32 = vector.shape_cast %31 : vector<1x128x128xbf16> to vector<128x128xbf16>
    %cst_36 = arith.constant dense<0.000000e+00> : vector<16x128xf32>
    %33 = tpu.matmul %30, %32, %cst_36 {dimension_numbers = #tpu.dot_dimension_numbers<[1], [0], [0], [1], [0, 0, 1, 1], [], []>} : vector<16x128xbf16>, vector<128x128xbf16>, vector<16x128xf32> -> vector<16x128xf32>
    %34 = arith.addf %29, %33 : vector<16x128xf32>
    %c1_37 = arith.constant 1 : index
    %c0_38 = arith.constant 0 : index
    %35 = vector.load %arg7[%c1_37, %c0_38] : memref<18x128xbf16, #tpu.memory_space<vmem>>, vector<16x128xbf16>
    %c1_39 = arith.constant 1 : index
    %c0_40 = arith.constant 0 : index
    %c0_41 = arith.constant 0 : index
    %36 = vector.load %arg4[%c1_39, %c0_40, %c0_41] : memref<3x128x128xbf16, #tpu.memory_space<vmem>>, vector<1x128x128xbf16>
    %37 = vector.shape_cast %36 : vector<1x128x128xbf16> to vector<128x128xbf16>
    %cst_42 = arith.constant dense<0.000000e+00> : vector<16x128xf32>
    %38 = tpu.matmul %35, %37, %cst_42 {dimension_numbers = #tpu.dot_dimension_numbers<[1], [0], [0], [1], [0, 0, 1, 1], [], []>} : vector<16x128xbf16>, vector<128x128xbf16>, vector<16x128xf32> -> vector<16x128xf32>
    %39 = arith.addf %34, %38 : vector<16x128xf32>
    %c2_43 = arith.constant 2 : index
    %c0_44 = arith.constant 0 : index
    %40 = vector.load %arg7[%c2_43, %c0_44] : memref<18x128xbf16, #tpu.memory_space<vmem>>, vector<16x128xbf16>
    %c2_45 = arith.constant 2 : index
    %c0_46 = arith.constant 0 : index
    %c0_47 = arith.constant 0 : index
    %41 = vector.load %arg4[%c2_45, %c0_46, %c0_47] : memref<3x128x128xbf16, #tpu.memory_space<vmem>>, vector<1x128x128xbf16>
    %42 = vector.shape_cast %41 : vector<1x128x128xbf16> to vector<128x128xbf16>
    %cst_48 = arith.constant dense<0.000000e+00> : vector<16x128xf32>
    %43 = tpu.matmul %40, %42, %cst_48 {dimension_numbers = #tpu.dot_dimension_numbers<[1], [0], [0], [1], [0, 0, 1, 1], [], []>} : vector<16x128xbf16>, vector<128x128xbf16>, vector<16x128xf32> -> vector<16x128xf32>
    %44 = arith.addf %39, %43 : vector<16x128xf32>
    %c0_49 = arith.constant 0 : index
    %c0_50 = arith.constant 0 : index
    %45 = vector.load %arg5[%c0_49, %c0_50] : memref<1x128xf32, #tpu.memory_space<vmem>>, vector<1x128xf32>
    %46 = vector.broadcast %45 : vector<1x128xf32> to vector<16x128xf32>
    %47 = arith.addf %44, %46 : vector<16x128xf32>
    %c0_51 = arith.constant 0 : index
    %c0_52 = arith.constant 0 : index
    %c1_53 = arith.constant 1 : index
    %c0_54 = arith.constant 0 : index
    %48 = vector.load %arg1[%c0_51, %c0_52, %c1_53, %c0_54] : memref<1x1x18x128xbf16, #tpu.memory_space<vmem>>, vector<1x1x16x128xbf16>
    %49 = vector.shape_cast %48 : vector<1x1x16x128xbf16> to vector<16x128xbf16>
    %50 = arith.extf %49 : vector<16x128xbf16> to vector<16x128xf32>
    %51 = arith.addf %47, %50 : vector<16x128xf32>
    %cst_55 = arith.constant 0.000000e+00 : f32
    %52 = vector.broadcast %cst_55 : f32 to vector<16x128xf32>
    %53 = arith.maximumf %51, %52 : vector<16x128xf32>
    %54 = arith.truncf %53 : vector<16x128xf32> to vector<16x128xbf16>
    %c0_56 = arith.constant 0 : index
    %c0_57 = arith.constant 0 : index
    %c0_58 = arith.constant 0 : index
    %55 = vector.load %arg6[%c0_56, %c0_57, %c0_58] : memref<1x16x128xbf16, #tpu.memory_space<vmem>>, vector<1x16x128xbf16>
    %56 = vector.shape_cast %55 : vector<1x16x128xbf16> to vector<16x128xbf16>
    %57 = vector.shape_cast %54 : vector<16x128xbf16> to vector<1x16x128xbf16>
    tpu.vector_store %arg6[%c0_56, %c0_57, %c0_58], %57 {strides = array<i32>} : memref<1x16x128xbf16, #tpu.memory_space<vmem>>, vector<1x16x128xbf16>,
    return
  }
  func.func @transform_0(%arg0: i32) -> (i32, i32, i32, i32) {
    %c0_i32 = arith.constant 0 : i32
    %c0_i32_0 = arith.constant 0 : i32
    %c0_i32_1 = arith.constant 0 : i32
    %c0_i32_2 = arith.constant 0 : i32
    return %arg0, %c0_i32, %c0_i32_0, %c0_i32_1 : i32, i32, i32, i32
  }
  func.func @transform_1(%arg0: i32) -> (i32, i32, i32) {
    %c0_i32 = arith.constant 0 : i32
    %c0_i32_0 = arith.constant 0 : i32
    %c0_i32_1 = arith.constant 0 : i32
    %c0_i32_2 = arith.constant 0 : i32
    return %c0_i32, %c0_i32_0, %c0_i32_1 : i32, i32, i32
  }
  func.func @transform_2(%arg0: i32) -> (i32, i32) {
    %c0_i32 = arith.constant 0 : i32
    %c0_i32_0 = arith.constant 0 : i32
    %c0_i32_1 = arith.constant 0 : i32
    return %c0_i32, %c0_i32_0 : i32, i32
  }
  func.func @transform_3(%arg0: i32) -> (i32, i32, i32) {
    %c0_i32 = arith.constant 0 : i32
    %c0_i32_0 = arith.constant 0 : i32
    %c0_i32_1 = arith.constant 0 : i32
    %c0_i32_2 = arith.constant 0 : i32
    return %c0_i32, %c0_i32_0, %c0_i32_1 : i32, i32, i32
  }
  func.func @transform_4(%arg0: i32) -> (i32, i32) {
    %c0_i32 = arith.constant 0 : i32
    %c0_i32_0 = arith.constant 0 : i32
    %c0_i32_1 = arith.constant 0 : i32
    return %c0_i32, %c0_i32_0 : i32, i32
  }
  func.func @transform_5(%arg0: i32) -> (i32, i32, i32) {
    %c0_i32 = arith.constant 0 : i32
    %c0_i32_0 = arith.constant 0 : i32
    %c0_i32_1 = arith.constant 0 : i32
    return %arg0, %c0_i32, %c0_i32_0 : i32, i32, i32
  }
}

</mosaic_0001>

<bundles_post_ra>
// kernel: _lambda_.3
= control target key start
LH: loop header
LB: loop body
LE: loop exit
PB: predicated region body
PF: predicated region fallthrough
CT: control target
= control target key end

     0   :  { %s1295_s18 = smov 0   ;;  %s1498_s0 = inlined_call_operand.vmem [shape: bf16[2,1,18,128], index: 0, kind: input, shape index: {}]   ;;  %s1499_s1 = inlined_call_operand.vmem [shape: bf16[3,128,128], index: 1, kind: input, shape index: {}]   ;;  %s1500_s2 = inlined_call_operand.vmem [shape: f32[1,128], index: 2, kind: input, shape index: {}, may-alias: {2,4}]   ;;  %s1501_s3 = inlined_call_operand.vmem [shape: bf16[3,128,128], index: 3, kind: input, shape index: {}]   ;;  %s1502_s4 = inlined_call_operand.vmem [shape: f32[1,128], index: 4, kind: input, shape index: {}, may-alias: {2,4}]   ;;  %s1503_s5 = inlined_call_operand.vmem [shape: bf16[2,16,128], index: 5, kind: output, shape index: {}]  }
   0x1 LB: > { %s908_s19 = sadd.s32 4294967295, %s1263_s18   ;;  %p912_p0 = scmp.ge.s32.totalorder %s1263_s18, 1  ;;  %s1263_s18 = sphi %s1295_s18, %s15_s18  }
   0x2   : > { %p187_p1 = scmp.lt.s32.totalorder %s1263_s18, 3 }
   0x4   : > { %p188_p2 = pnand %p912_p0, %p187_p1 }
   0x5   : > { %p215_p3 = scmp.lt.s32.totalorder (!%p188_p2), %s908_s19, 1 }
   0x6   : > { %191 = sbr.rel (%p188_p2) target bundleno = 371 (0x173), region = 40 }
   0xb   : > { %v1190_v0 = vld [vmem:[%s1499_s1 + $0x78] sm:$0xff]  ;;  %v1189_v3 = vld [vmem:[%s1499_s1 + $0x70] sm:$0xff]  ;;  %s1507_s19 = smov (!%p215_p3, %s908_s19), 1  ;;  %v1188_v6 = vld [vmem:[%s1499_s1 + $0x68] sm:$0xff]  ;;  %vm270_vm0 = vsmask.f32 7424 }
   0xc   : > { %v1182_v1 = vld [vmem:[%s1499_s1 + $0x38] sm:$0xff]  ;;  %332 = vmatpush.bf16.msra.mxu0 %v1190_v0  ;;  %v1181_v4 = vld [vmem:[%s1499_s1 + $0x30] sm:$0xff]  ;;  %s1246_s7 = smul.u32 12, %s1507_s19  ;;  %v1180_v7 = vld [vmem:[%s1499_s1 + $0x28] sm:$0xff]  ;;  %vm430_vm1 = vcmask 1046528   ;;  %vm507_vm2 = vcmask 1040384  }
   0xd   : > { %v1198_v2 = vld [vmem:[%s1499_s1 + $0xb8] sm:$0xff]  ;;  %395 = vmatpush.bf16.msra.mxu1 %v1182_v1  ;;  %v1197_v5 = vld [vmem:[%s1499_s1 + $0xb0] sm:$0xff]  ;;  %v1196_v8 = vld [vmem:[%s1499_s1 + $0xa8] sm:$0xff]  ;;  %vm508_vm3 = vsmask.f32 256  ;;  %vm542_vm7 = vcmask 1043456  }
   0xe   : > { %483 = vmatpush.bf16.msra.mxu2 %v1198_v2  ;;  %s1336_s16 = scalar_lea.vmem %s1498_s0, %s1246_s7  ;;  %v1187_v9 = vld [vmem:[%s1499_s1 + $0x60] sm:$0xff]  ;;  %v1186_v13 = vld [vmem:[%s1499_s1 + $0x58] sm:$0xff]  ;;  %v1185_v18 = vld [vmem:[%s1499_s1 + $0x50] sm:$0xff]  ;;  %vm513_vm5 = vsmask.f32 7938 }
   0xf   : > { %v1179_v10 = vld [vmem:[%s1499_s1 + $0x20] sm:$0xff]  ;;  %v244_v12 = vld [vmem:[%s1336_s16 + $0x8] sm:$0x1]  ;;  %v1178_v14 = vld [vmem:[%s1499_s1 + $0x18] sm:$0xff]  ;;  %vm520_vm9 = vsmask.f32 4368 }
  0x10   : > { %333 = vmatpush.bf16.msra.mxu0 %v1189_v3  ;;  %v1195_v11 = vld [vmem:[%s1499_s1 + $0xa0] sm:$0xff]  ;;  %v267_v15 = vunpack.c.l.b16 %v244_v12  ;;  %v1194_v16 = vld [vmem:[%s1499_s1 + $0x98] sm:$0xff]  ;;  %v1177_v19 = vld [vmem:[%s1499_s1 + $0x10] sm:$0xff] }
  0x11   : > { %396 = vmatpush.bf16.msra.mxu1 %v1181_v4  ;;  %v1358_v17 = vld [vmem:[%s1336_s16] sm:$0xff]   ;;  %v1193_v22 = vld [vmem:[%s1499_s1 + $0x90] sm:$0xff]  ;;  %v1184_v25 = vld [vmem:[%s1499_s1 + $0x48] sm:$0xff] }
  0x12   : > { %484 = vmatpush.bf16.msra.mxu2 %v1197_v5  ;;  %v269_v20 = vpack.c.b16 %v267_v15, %v267_v15  ;;  %v274_v21 = vshll.u32 %v1358_v17, 16  ;;  %v1240_v23 = vld [vmem:[%s1336_s16] sm:$0xf0]  ;;  %v1241_v24 = vld [vmem:[%s1336_s16] sm:$0xe]  ;;  %v1176_v26 = vld [vmem:[%s1499_s1 + $0x8] sm:$0xff] }
  0x13   : > { %v272_v27 = vshrl.u32 %v1358_v17, 16  ;;  %v1192_v30 = vld [vmem:[%s1499_s1 + $0x88] sm:$0xff]  ;;  %v1242_v31 = vor.u32 %v1241_v24, %v1240_v23  ;;  %v1183_v32 = vld [vmem:[%s1499_s1 + $0x40] sm:$0xff]  ;;  %v1206_v41 = vld [vmem:[%s1501_s3 + $0x38] sm:$0xff] }
  0x14   : > { %334 = vmatpush.bf16.msra.mxu0 %v1188_v6  ;;  %v276_v28 = vrot.slane %v274_v21, 1  ;;  %v279_v29 = vshll.u32 %v269_v20, 16  ;;  %v1175_v33 = vld [vmem:[%s1499_s1] sm:$0xff]  ;;  %v432_v38 = vrot.slane %v269_v20, 1  ;;  %v1205_v42 = vld [vmem:[%s1501_s3 + $0x30] sm:$0xff]  ;;  %vm1401_vm4 = vmand %vm507_vm2, %vm508_vm3 }
  0x15   : > { %397 = vmatpush.bf16.msra.mxu1 %v1180_v7  ;;  %v1191_v36 = vld [vmem:[%s1499_s1 + $0x80] sm:$0xff]  ;;  %v431_v37 = vrot.slane %v1242_v31, 1  ;;  %v515_v45 = vld [vmem:[#allocation2 + $0x8] sm:$0x1]  ;;  %vm514_vm6 = vmand %vm507_vm2, %vm513_vm5 }
  0x16   : > { %485 = vmatpush.bf16.msra.mxu2 %v1196_v8  ;;  %v277_v34 = vor.u32 %v276_v28, %v272_v27  ;;  %v281_v35 = vrot.slane %v279_v29, 1  ;;  %v510_v44 = vld [vmem:[#allocation2] sm:$0x1]  ;;  %v516_v47 = vsel %vm514_vm6, 0, %v515_v45  ;;  %v1222_v48 = vld [vmem:[%s1501_s3 + $0xb8] sm:$0xff]  ;;  %v1204_v49 = vld [vmem:[%s1501_s3 + $0x28] sm:$0xff] }
  0x17   : > { %v433_v40 = vsel %vm430_vm1, %v431_v37, %v432_v38  ;;  %v511_v46 = vsel %vm1401_vm4, 0, %v510_v44  ;;  %517 = vst [vmem:[#allocation2 + $0x8] sm:$0x1] %v516_v47  ;;  %v1214_v50 = vld [vmem:[%s1501_s3 + $0x78] sm:$0xff]  ;;  %v1221_v51 = vld [vmem:[%s1501_s3 + $0xb0] sm:$0xff]  ;;  %v1203_v52 = vld [vmem:[%s1501_s3 + $0x20] sm:$0xff] }
  0x18   : > { %335 = vmatpush.bf16.msra.mxu0 %v1187_v9  ;;  %v282_v39 = vsel %vm270_vm0, %v277_v34, %v281_v35  ;;  %512 = vst [vmem:[#allocation2] sm:$0x1] %v511_v46  ;;  %656 = vmatpush.bf16.msra.mxu3 %v1214_v50  ;;  %v1213_v53 = vld [vmem:[%s1501_s3 + $0x70] sm:$0xff]  ;;  %v1220_v54 = vld [vmem:[%s1501_s3 + $0xa8] sm:$0xff]  ;;  %v1202_v55 = vld [vmem:[%s1501_s3 + $0x18] sm:$0xff] }
  0x19   : > { %398 = vmatpush.bf16.msra.mxu1 %v1179_v10  ;;  %v1212_v56 = vld [vmem:[%s1501_s3 + $0x68] sm:$0xff]  ;;  %v1219_v57 = vld [vmem:[%s1501_s3 + $0xa0] sm:$0xff]  ;;  %v1201_v58 = vld [vmem:[%s1501_s3 + $0x10] sm:$0xff] }
  0x1a   : > { %486 = vmatpush.bf16.msra.mxu2 %v1195_v11  ;;  %v1211_v59 = vld [vmem:[%s1501_s3 + $0x60] sm:$0xff]  ;;  %v1218_v60 = vld [vmem:[%s1501_s3 + $0x98] sm:$0xff]  ;;  %v1200_v61 = vld [vmem:[%s1501_s3 + $0x8] sm:$0xff] }
  0x1b   : > { %v1210_v62 = vld [vmem:[%s1501_s3 + $0x58] sm:$0xff]  ;;  %v1217_v63 = vld [vmem:[%s1501_s3 + $0x90] sm:$0xff]  ;;  %v1199_v2 = vld [vmem:[%s1501_s3] sm:$0xff] }
  0x1c   : > { %336 = vmatpush.bf16.msra.mxu0 %v1186_v13  ;;  %657 = vmatpush.bf16.msra.mxu3 %v1213_v53  ;;  %v1209_v3 = vld [vmem:[%s1501_s3 + $0x50] sm:$0xff]  ;;  %v1255_v5 = vld [vmem:[%s1500_s2] ss:$0 sm:$0xff]  ;;  %v1216_v6 = vld [vmem:[%s1501_s3 + $0x88] sm:$0xff] }
  0x1d   : > { %399 = vmatpush.bf16.msra.mxu1 %v1178_v14  ;;  %v1208_v9 = vld [vmem:[%s1501_s3 + $0x48] sm:$0xff]  ;;  %v1215_v10 = vld [vmem:[%s1501_s3 + $0x80] sm:$0xff]  ;;  %vm543_vm8 = vmand %vm542_vm7, %vm513_vm5 }
  0x1e   : > { %487 = vmatpush.bf16.msra.mxu2 %v1194_v16  ;;  %v1207_v12 = vld [vmem:[%s1501_s3 + $0x40] sm:$0xff]  ;;  %vm521_vm10 = vmor %vm508_vm3, %vm520_vm9 }
  0x20   : > { %337 = vmatpush.bf16.msra.mxu0 %v1185_v18  ;;  %658 = vmatpush.bf16.msra.mxu3 %v1212_v56 }
  0x21   : > { %400 = vmatpush.bf16.msra.mxu1 %v1177_v19 }
  0x22   : > { %488 = vmatpush.bf16.msra.mxu2 %v1193_v22 }
  0x24   : > { %338 = vmatpush.bf16.msra.mxu0 %v1184_v25  ;;  %659 = vmatpush.bf16.msra.mxu3 %v1211_v59  ;;  %v544_v25 = vld [vmem:[#allocation2] sm:$0xf] }
  0x25   : > { %401 = vmatpush.bf16.msra.mxu1 %v1176_v26 }
  0x26   : > { %489 = vmatpush.bf16.msra.mxu2 %v1192_v30 }
  0x28   : > { %339 = vmatpush.bf16.msra.mxu0 %v1183_v32  ;;  %660 = vmatpush.bf16.msra.mxu3 %v1210_v62  ;;  %v1234_v62 = vunpack.c.h.bf16 %v1358_v17 }
  0x29   : > { %402 = vmatpush.bf16.msra.mxu1 %v1175_v33  ;;  %v548_v33 = vld [vmem:[#allocation2 + $0x8] sm:$0x1] }
  0x2a   : > { %490 = vmatpush.bf16.msra.mxu2 %v1191_v36 }
  0x2b   : > { %340 = vmatmul.bf16.vlgmr.msra.gmra.mxu0 %v282_v39 }
  0x2c   : > { %403 = vmatmul.bf16.vlgmr.msra.gmra.mxu1 %v1358_v17  ;;  %719 = vmatpush.bf16.msrb.mxu0 %v1206_v41 }
  0x2d   : > { %491 = vmatmul.bf16.vlgmr.msra.gmra.mxu2 %v433_v40  ;;  %806 = vmatpush.bf16.msrb.mxu1 %v1222_v48 }
  0x2e   : > { %661 = vmatpush.bf16.msra.mxu3 %v1209_v3  ;;  %v839_v3 = vrot.slane %v1234_v62, 1 }
  0x30   : > { %720 = vmatpush.bf16.msrb.mxu0 %v1205_v42 }
  0x31   : > { %807 = vmatpush.bf16.msrb.mxu1 %v1221_v51 }
  0x32   : > { %662 = vmatpush.bf16.msra.mxu3 %v1208_v9 }
  0x34   : > { %721 = vmatpush.bf16.msrb.mxu0 %v1204_v49 }
  0x35   : > { %808 = vmatpush.bf16.msrb.mxu1 %v1220_v54 }
  0x36   : > { %663 = vmatpush.bf16.msra.mxu3 %v1207_v12 }
  0x38   : > { %722 = vmatpush.bf16.msrb.mxu0 %v1203_v52 }
  0x39   : > { %809 = vmatpush.bf16.msrb.mxu1 %v1219_v57 }
  0x3c   : > { %723 = vmatpush.bf16.msrb.mxu0 %v1202_v55 }
  0x3d   : > { %810 = vmatpush.bf16.msrb.mxu1 %v1218_v60  ;;  %v830_v60 = vld [vmem:[%s1336_s16 + $0x8] sm:$0x1]  ;;  %s1174_s16 = sshll.u32 %s1507_s19, 3 }
  0x3e   : > { %s224_s12 = scalar_lea.vmem %s1503_s5, %s1174_s16 }
  0x40   : > { %724 = vmatpush.bf16.msrb.mxu0 %v1201_v58 }
  0x41   : > { %811 = vmatpush.bf16.msrb.mxu1 %v1217_v63  ;;  %v833_v63 = vunpack.c.l.bf16 %v830_v60 }
  0x44   : > { %725 = vmatpush.bf16.msrb.mxu0 %v1200_v61  ;;  %v1233_v61 = vunpack.c.l.bf16 %v1358_v17 }
  0x45   : > { %812 = vmatpush.bf16.msrb.mxu1 %v1216_v6  ;;  %v841_v6 = vrot.slane %v833_v63, 1 }
  0x47   : > { %v842_v17 = vsel %vm430_vm1, %v839_v3, %v841_v6 }
  0x48   : > { %726 = vmatpush.bf16.msrb.mxu0 %v1199_v2  ;;  %v838_v2 = vrot.slane %v1233_v61, 1 }
  0x49   : > { %813 = vmatpush.bf16.msrb.mxu1 %v1215_v10 }
  0x4a   : > { %v840_v9 = vsel %vm430_vm1, %v838_v2, %v839_v3 }
  0xa8   : > { %v341_v0 = vpop.f32.mrf.mxu0 }
  0xa9   : > { %v404_v1 = vpop.f32.mrf.mxu1 }
  0xaa   : > { %v405_v4 = vadd.f32 %v404_v1, %v341_v0  ;;  %v1256_v1 = vld [vmem:[%s1502_s4] ss:$0 sm:$0xff] }
  0xb0   : > { %v492_v7 = vpop.f32.mrf.mxu2  ;;  %v343_v13 = vpop.f32.mrf.mxu0 }
  0xb1   : > { %v497_v8 = vadd.f32 %v492_v7, %v405_v4  ;;  %v406_v14 = vpop.f32.mrf.mxu1 }
  0xb2   : > { %v407_v18 = vadd.f32 %v406_v14, %v343_v13 }
  0xb3   : > { %v503_v11 = vadd.f32 %v1255_v5, %v497_v8 }
  0xb5   : > { %v505_v15 = vmax.f32 %v503_v11, 0.0 }
  0xb7   : > { %v518_v16 = vpack.c.bf16 %v505_v15, %v505_v15 }
  0xb8   : > { %v494_v19 = vpop.f32.mrf.mxu2 }
  0xb9   : > { %v523_v20 = vshrl.u32 %v518_v16, 16  ;;  %v498_v21 = vadd.f32 %v494_v19, %v407_v18  ;;  %v526_v23 = vshll.u32 %v518_v16, 16 }
  0xbb   : > { %v525_v22 = vrot.slane %v523_v20, 7  ;;  %v504_v24 = vadd.f32 %v1255_v5, %v498_v21 }
  0xbd   : > { %v528_v26 = vor.u32 %v526_v23, %v525_v22  ;;  %v506_v27 = vmax.f32 %v504_v24, 0.0  ;;  %v529_v34 = vrot.slane %v525_v22, 4 }
  0xbf   : > { %v545_v28 = vsel %vm543_vm8, %v528_v26, %v544_v25  ;;  %v519_v29 = vpack.c.bf16 %v506_v27, %v506_v27 }
  0xc0   : > { %546 = vst [vmem:[#allocation2] sm:$0xf] %v545_v28 }
  0xc1   : > { %v531_v30 = vshrl.u32 %v519_v29, 16  ;;  %v534_v32 = vshll.u32 %v519_v29, 16 }
  0xc3   : > { %v533_v31 = vrot.slane %v531_v30, 7 }
  0xc5   : > { %v536_v35 = vor.u32 %v534_v32, %v533_v31  ;;  %v538_v36 = vrot.slane %v533_v31, 4 }
  0xc7   : > { %v537_v37 = vsel %vm521_vm10, %v529_v34, %v536_v35  ;;  %v549_v38 = vsel %vm1401_vm4, %v538_v36, %v548_v33  ;;  %v1244_v44 = vld [vmem:[#allocation2] sm:$0xe] }
  0xc8   : > { %547 = vst [vmem:[#allocation2 + $0x4] sm:$0xf] %v537_v37 }
  0xc9   : > { %550 = vst [vmem:[#allocation2 + $0x8] sm:$0x1] %v549_v38 }
  0xcf   : > { %v1228_v39 = vld [vmem:[#allocation2] sm:$0xff]  }
  0xd0   : > { %v1243_v40 = vld [vmem:[#allocation2] sm:$0xf0]  ;;  %v598_v41 = vshll.u32 %v1228_v39, 16  ;;  %727 = vmatmul.bf16.vlgmr.msrb.gmra.mxu0 %v1228_v39  ;;  %v569_v42 = vld [vmem:[#allocation2 + $0x8] sm:$0x1]  ;;  %v596_v49 = vshrl.u32 %v1228_v39, 16 }
  0xd1   : > { %v592_v45 = vunpack.c.l.b16 %v569_v42  ;;  %v1245_v46 = vor.u32 %v1244_v44, %v1243_v40 }
  0xd2   : > { %v600_v47 = vrot.slane %v598_v41, 1 }
  0xd3   : > { %v594_v48 = vpack.c.b16 %v592_v45, %v592_v45  ;;  %v754_v50 = vrot.slane %v1245_v46, 1 }
  0xd4   : > { %v601_v53 = vor.u32 %v600_v47, %v596_v49 }
  0xd5   : > { %v755_v51 = vrot.slane %v594_v48, 1  ;;  %v603_v52 = vshll.u32 %v594_v48, 16 }
  0xd7   : > { %v756_v43 = vsel %vm430_vm1, %v754_v50, %v755_v51  ;;  %v605_v54 = vrot.slane %v603_v52, 1 }
  0xd8   : > { %814 = vmatmul.bf16.vlgmr.msrb.gmra.mxu1 %v756_v43 }
  0xd9   : > { %v606_v55 = vsel %vm270_vm0, %v601_v53, %v605_v54 }
  0xda   : > { %664 = vmatmul.bf16.vlgmr.msra.gmra.mxu3 %v606_v55 }
 0x14d   : > { %v728_v56 = vpop.f32.mrf.mxu0 }
 0x155   : > { %v815_v57 = vpop.f32.mrf.mxu1  ;;  %v730_v4 = vpop.f32.mrf.mxu0 }
 0x15d   : > { %v665_v58 = vpop.f32.mrf.mxu3  ;;  %v817_v10 = vpop.f32.mrf.mxu1 }
 0x15e   : > { %v729_v59 = vadd.f32 %v728_v56, %v665_v58 }
 0x160   : > { %v820_v0 = vadd.f32 %v815_v57, %v729_v59 }
 0x162   : > { %v826_v7 = vadd.f32 %v1256_v1, %v820_v0 }
 0x164   : > { %v845_v12 = vadd.f32 %v840_v9, %v826_v7 }
 0x165   : > { %v667_v5 = vpop.f32.mrf.mxu3 }
 0x166   : > { %v731_v8 = vadd.f32 %v730_v4, %v667_v5  ;;  %v847_v15 = vmax.f32 %v845_v12, 0.0 }
 0x168   : > { %v821_v11 = vadd.f32 %v817_v10, %v731_v8 }
 0x16a   : > { %v827_v13 = vadd.f32 %v1256_v1, %v821_v11 }
 0x16c   : > { %v846_v14 = vadd.f32 %v842_v17, %v827_v13 }
 0x16e   : > { %v848_v16 = vmax.f32 %v846_v14, 0.0 }
 0x170   : > { %v1238_v18 = vpack.c.bf16 %v848_v16, %v847_v15 }
 0x172   : > { %1239 = vst [vmem:[%s224_s12] sm:$0xff] %v1238_v18  }
 0x173 PF: > { %s15_s18 = sadd.s32 1, %s1263_s18  }
 0x174   : > { %p12_p4 = scmp.ge.s32.totalorder %s15_s18, 4  }
 0x176   :  { %14 = sbr.rel (!%p12_p4) target bundleno = 1 (0x1), region = 74 }

// kernel: _lambda_.2
= control target key start
LH: loop header
LB: loop body
LE: loop exit
PB: predicated region body
PF: predicated region fallthrough
CT: control target
= control target key end

     0   :  { %12 = vsyncpa [#allocation4], 0  ;;  %s1738_s0 = inlined_call_operand.vmem [shape: bf16[2,2,17,128], index: 0, kind: input, shape index: {}]   ;;  %s1739_s1 = inlined_call_operand.hbm [shape: bf16[3,128,128], index: 1, kind: input, shape index: {}]   ;;  %s1740_s2 = inlined_call_operand.vmem [shape: f32[1,128], index: 2, kind: input, shape index: {}, may-alias: {2,4,6}]   ;;  %s1741_s3 = inlined_call_operand.hbm [shape: bf16[3,128,128], index: 3, kind: input, shape index: {}]   ;;  %s1742_s4 = inlined_call_operand.vmem [shape: f32[1,128], index: 4, kind: input, shape index: {}, may-alias: {2,4,6}]   ;;  %s1743_s5 = inlined_call_operand.hbm [shape: bf16[128,128], index: 5, kind: input, shape index: {}]   ;;  %s1744_s6 = inlined_call_operand.vmem [shape: f32[1,128], index: 6, kind: input, shape index: {}, may-alias: {2,4,6}]   ;;  %s1745_s7 = inlined_call_operand.vmem [shape: bf16[2,16,128], index: 7, kind: output, shape index: {}]  }
   0x1   :  { %13 = vsyncpa [#allocation6], 0  ;;  %s1655_s24 = smov 0  }
   0x2 LB: > { %s1661_s25 = sadd.s32 4294967295, %s1608_s24   ;;  %p1128_p0 = scmp.ge.s32.totalorder %s1608_s24, 1  ;;  %s1608_s24 = sphi %s1655_s24, %s19_s24  }
   0x3   : > { %p202_p1 = scmp.lt.s32.totalorder %s1608_s24, 3  ;;  %p1482_p2 = scmp.eq.s32.totalorder %s1661_s25, 0 }
   0x4   : > { %s230_s28 = sshll.u32 %s1741_s3, 4  ;;  %s213_s9 = sshll.u32 %s1739_s1, 4  ;;  %s231_s28 = int_to_ptr.hbm [resolvable:$true] %s230_s28  ;;  %s214_s9 = int_to_ptr.hbm [resolvable:$true] %s213_s9 }
   0x5   : > { %p1669_p3 = pnand %p1128_p0, %p202_p1  ;;  %s1610_s10 = smov [#allocation5]  }
   0x6   : > { %s232_s11 = sshll.u32 %s1610_s10, 4  ;;  %s1611_s12 = smov [#allocation3]   ;;  %s233_s11 = int_to_ptr.vmem [resolvable:$true] %s232_s11 }
   0x7   : > { %p1472_p4 = pneg %p1669_p3  ;;  %s215_s13 = sshll.u32 %s1611_s12, 4  ;;  %s216_s13 = int_to_ptr.vmem [resolvable:$true] %s215_s13 }
   0x8   : > { %s247_s16 = sshll.u32 %s1743_s5, 4  ;;  %s1612_s17 = smov 64   ;;  %s248_s16 = int_to_ptr.hbm [resolvable:$true] %s247_s16 }
   0x9   : > { %p1473_p5 = pnand %p1482_p2, %p1472_p4  ;;  %s1613_s18 = smov 4  }
   0xa   : > { %s1614_s19 = smov [#allocation7]   ;;  %276 = sbr.rel (%p1669_p3) target bundleno = 380 (0x17c), region = 48 }
   0xb   : > { %1478 = dma.hbm_to_vmem [thread:$0]  (!%p1473_p5), %s231_s28, 3072, %s233_s11, [#allocation6], %s1612_s17, %s1612_s17, %s1613_s18  }
   0xc   : > { %1475 = dma.hbm_to_vmem [thread:$0]  (!%p1473_p5), %s214_s9, 3072, %s216_s13, [#allocation4], %s1612_s17, %s1612_s17, %s1613_s18  }
   0xd   : > { %s249_s20 = sshll.u32 %s1614_s19, 4  ;;  %s250_s20 = int_to_ptr.vmem [resolvable:$true] %s249_s20 }
   0xe   : > { %1481 = dma.hbm_to_vmem [thread:$0]  (!%p1473_p5), %s248_s16, 1024, %s250_s20, [#allocation6], %s1612_s17, %s1612_s17, %s1613_s18  }
   0xf   : > { %1599 = dma.done.wait (%p1482_p2), [#allocation4], 3072  }
  0x10   : > { %1601 = vsyncadd (%p1482_p2), [#allocation4], 4294964224 }
  0x11   : > { %1603 = dma.done.wait (%p1482_p2), [#allocation6], 4096  }
  0x12   : > { %1605 = vsyncadd (%p1482_p2), [#allocation6], 4294963200  ;;  %p319_p6 = scmp.lt.s32.totalorder %s1661_s25, 1  ;;  %v1404_v0 = vld [vmem:[#allocation3 + $0x78] sm:$0xff]  ;;  %v1403_v3 = vld [vmem:[#allocation3 + $0x70] sm:$0xff]  ;;  %vm618_vm1 = vcmask 1040384  }
  0x13   : > { %v1395_v1 = vld [vmem:[#allocation3 + $0x38] sm:$0xff]  ;;  %422 = vmatpush.bf16.msra.mxu0 %v1404_v0  ;;  %v1394_v4 = vld [vmem:[#allocation3 + $0x30] sm:$0xff]  ;;  %v1402_v6 = vld [vmem:[#allocation3 + $0x68] sm:$0xff]  ;;  %vm532_vm0 = vsmask.f32 7424  ;;  %vm653_vm6 = vcmask 1043456  }
  0x14   : > { %v1413_v2 = vld [vmem:[#allocation3 + $0xb8] sm:$0xff]  ;;  %s1750_s25 = smov (!%p319_p6, %s1661_s25), 1  ;;  %490 = vmatpush.bf16.msra.mxu1 %v1395_v1  ;;  %v1412_v5 = vld [vmem:[#allocation3 + $0xb0] sm:$0xff]  ;;  %v1393_v7 = vld [vmem:[#allocation3 + $0x28] sm:$0xff]  ;;  %vm619_vm2 = vsmask.f32 256 }
  0x15   : > { %594 = vmatpush.bf16.msra.mxu2 %v1413_v2  ;;  %s1459_s21 = smul.u32 24, %s1750_s25  ;;  %v1411_v8 = vld [vmem:[#allocation3 + $0xa8] sm:$0xff]  ;;  %v1401_v9 = vld [vmem:[#allocation3 + $0x60] sm:$0xff]  ;;  %v1400_v13 = vld [vmem:[#allocation3 + $0x58] sm:$0xff]  ;;  %vm624_vm4 = vsmask.f32 7938 }
  0x16   : > { %v1392_v10 = vld [vmem:[#allocation3 + $0x20] sm:$0xff]  ;;  %v1391_v14 = vld [vmem:[#allocation3 + $0x18] sm:$0xff]  ;;  %v1399_v18 = vld [vmem:[#allocation3 + $0x50] sm:$0xff]  ;;  %vm631_vm8 = vsmask.f32 4368  ;;  %vm865_vm10 = vcmask 1046528  }
  0x17   : > { %423 = vmatpush.bf16.msra.mxu0 %v1403_v3  ;;  %s1701_s26 = scalar_lea.vmem %s1738_s0, %s1459_s21  ;;  %v1410_v11 = vld [vmem:[#allocation3 + $0xa0] sm:$0xff]  ;;  %v1409_v15 = vld [vmem:[#allocation3 + $0x98] sm:$0xff]  ;;  %v1390_v19 = vld [vmem:[#allocation3 + $0x10] sm:$0xff]  ;;  %s1386_s10 = sshll.u32 %s1750_s25, 3 }
  0x18   : > { %491 = vmatpush.bf16.msra.mxu1 %v1394_v4  ;;  %v506_v12 = vld [vmem:[%s1701_s26 + $0x8] sm:$0x1]  ;;  %v1405_v16 = vld [vmem:[%s1701_s26] sm:$0xff]  ;;  %v1398_v23 = vld [vmem:[#allocation3 + $0x48] sm:$0xff]  ;;  %s328_s13 = scalar_lea.vmem %s1745_s7, %s1386_s10 }
  0x19   : > { %595 = vmatpush.bf16.msra.mxu2 %v1412_v5  ;;  %v529_v17 = vunpack.c.l.b16 %v506_v12  ;;  %v1408_v20 = vld [vmem:[#allocation3 + $0x90] sm:$0xff]  ;;  %v536_v22 = vshll.u32 %v1405_v16, 16  ;;  %v1389_v24 = vld [vmem:[#allocation3 + $0x8] sm:$0xff]  ;;  %v534_v26 = vshrl.u32 %v1405_v16, 16  ;;  %v1397_v29 = vld [vmem:[#allocation3 + $0x40] sm:$0xff] }
  0x1a   : > { %v1407_v25 = vld [vmem:[#allocation3 + $0x88] sm:$0xff]  ;;  %v1388_v30 = vld [vmem:[#allocation3] sm:$0xff]  ;;  %v1387_v35 = vld [vmem:[%s1701_s26] sm:$0xff] }
  0x1b   : > { %424 = vmatpush.bf16.msra.mxu0 %v1402_v6  ;;  %v531_v21 = vpack.c.b16 %v529_v17, %v529_v17  ;;  %v538_v27 = vrot.slane %v536_v22, 1  ;;  %v1406_v31 = vld [vmem:[#allocation3 + $0x80] sm:$0xff]  ;;  %v1421_v37 = vld [vmem:[#allocation5 + $0x38] sm:$0xff]  ;;  %v1420_v38 = vld [vmem:[#allocation5 + $0x30] sm:$0xff] }
  0x1c   : > { %492 = vmatpush.bf16.msra.mxu1 %v1393_v7  ;;  %v1396_v34 = vld [vmem:[%s1701_s26 + $0xc] sm:$0xff]  ;;  %vm1709_vm3 = vmand %vm618_vm1, %vm619_vm2  ;;  %v621_v40 = vld [vmem:[#allocation2] sm:$0x1] }
  0x1d   : > { %596 = vmatpush.bf16.msra.mxu2 %v1411_v8  ;;  %v541_v28 = vshll.u32 %v531_v21, 16  ;;  %v539_v32 = vor.u32 %v538_v27, %v534_v26  ;;  %v626_v41 = vld [vmem:[#allocation2 + $0x8] sm:$0x1]  ;;  %v622_v42 = vsel %vm1709_vm3, 0, %v621_v40  ;;  %vm625_vm5 = vmand %vm618_vm1, %vm624_vm4  ;;  %v1419_v46 = vld [vmem:[#allocation5 + $0x28] sm:$0xff] }
  0x1e   : > { %623 = vst [vmem:[#allocation2] sm:$0x1] %v622_v42  ;;  %v627_v43 = vsel %vm625_vm5, 0, %v626_v41  ;;  %v1437_v44 = vld [vmem:[#allocation5 + $0xb8] sm:$0xff]  ;;  %v1436_v48 = vld [vmem:[#allocation5 + $0xb0] sm:$0xff]  ;;  %v1418_v50 = vld [vmem:[#allocation5 + $0x20] sm:$0xff] }
  0x1f   : > { %425 = vmatpush.bf16.msra.mxu0 %v1401_v9  ;;  %v543_v33 = vrot.slane %v541_v28, 1  ;;  %v1446_v45 = vld [vmem:[#allocation7 + $0x38] sm:$0xff]  ;;  %628 = vst [vmem:[#allocation2 + $0x8] sm:$0x1] %v627_v43  ;;  %v1445_v49 = vld [vmem:[#allocation7 + $0x30] sm:$0xff]  ;;  %v1435_v52 = vld [vmem:[#allocation5 + $0xa8] sm:$0xff] }
  0x20   : > { %493 = vmatpush.bf16.msra.mxu1 %v1392_v10  ;;  %v1429_v47 = vld [vmem:[#allocation5 + $0x78] sm:$0xff]  ;;  %v1428_v51 = vld [vmem:[#allocation5 + $0x70] sm:$0xff]  ;;  %v1444_v53 = vld [vmem:[#allocation7 + $0x28] sm:$0xff] }
  0x21   : > { %597 = vmatpush.bf16.msra.mxu2 %v1410_v11  ;;  %v544_v36 = vsel %vm532_vm0, %v539_v32, %v543_v33  ;;  %767 = vmatpush.bf16.msra.mxu3 %v1429_v47  ;;  %v1417_v54 = vld [vmem:[#allocation5 + $0x18] sm:$0xff]  ;;  %v1427_v55 = vld [vmem:[#allocation5 + $0x68] sm:$0xff]  ;;  %v1434_v56 = vld [vmem:[#allocation5 + $0xa0] sm:$0xff] }
  0x22   : > { %v1443_v57 = vld [vmem:[#allocation7 + $0x20] sm:$0xff]  ;;  %v1416_v58 = vld [vmem:[#allocation5 + $0x10] sm:$0xff]  ;;  %v1433_v60 = vld [vmem:[#allocation5 + $0x98] sm:$0xff] }
  0x23   : > { %426 = vmatpush.bf16.msra.mxu0 %v1400_v13  ;;  %v1426_v59 = vld [vmem:[#allocation5 + $0x60] sm:$0xff]  ;;  %v1442_v61 = vld [vmem:[#allocation7 + $0x18] sm:$0xff]  ;;  %v1415_v62 = vld [vmem:[#allocation5 + $0x8] sm:$0xff] }
  0x24   : > { %494 = vmatpush.bf16.msra.mxu1 %v1391_v14  ;;  %v1425_v63 = vld [vmem:[#allocation5 + $0x58] sm:$0xff]  ;;  %v1432_v0 = vld [vmem:[#allocation5 + $0x90] sm:$0xff]  ;;  %v1414_v4 = vld [vmem:[#allocation5] sm:$0xff] }
  0x25   : > { %598 = vmatpush.bf16.msra.mxu2 %v1409_v15  ;;  %768 = vmatpush.bf16.msra.mxu3 %v1428_v51  ;;  %v1441_v1 = vld [vmem:[#allocation7 + $0x10] sm:$0xff]  ;;  %v1431_v8 = vld [vmem:[#allocation5 + $0x88] sm:$0xff]  ;;  %v1430_v13 = vld [vmem:[#allocation5 + $0x80] sm:$0xff] }
  0x26   : > { %v1424_v5 = vld [vmem:[#allocation5 + $0x50] sm:$0xff]  ;;  %v1440_v9 = vld [vmem:[#allocation7 + $0x8] sm:$0xff]  ;;  %v1439_v14 = vld [vmem:[#allocation7] sm:$0xff] }
  0x27   : > { %427 = vmatpush.bf16.msra.mxu0 %v1399_v18  ;;  %v1501_v7 = vld [vmem:[%s1740_s2] ss:$0 sm:$0xff]  ;;  %v1423_v12 = vld [vmem:[#allocation5 + $0x48] sm:$0xff]  ;;  %v1422_v16 = vld [vmem:[#allocation5 + $0x40] sm:$0xff] }
  0x28   : > { %495 = vmatpush.bf16.msra.mxu1 %v1390_v19  ;;  %vm654_vm7 = vmand %vm653_vm6, %vm624_vm4 }
  0x29   : > { %599 = vmatpush.bf16.msra.mxu2 %v1408_v20  ;;  %769 = vmatpush.bf16.msra.mxu3 %v1427_v55  ;;  %v1438_v20 = vld [vmem:[%s1701_s26 + $0xc] sm:$0xff]  ;;  %vm632_vm9 = vmor %vm619_vm2, %vm631_vm8 }
  0x2b   : > { %428 = vmatpush.bf16.msra.mxu0 %v1398_v23 }
  0x2c   : > { %496 = vmatpush.bf16.msra.mxu1 %v1389_v24 }
  0x2d   : > { %600 = vmatpush.bf16.msra.mxu2 %v1407_v25  ;;  %770 = vmatpush.bf16.msra.mxu3 %v1426_v59 }
  0x2f   : > { %429 = vmatpush.bf16.msra.mxu0 %v1397_v29  ;;  %v655_v29 = vld [vmem:[#allocation2] sm:$0xf] }
  0x30   : > { %497 = vmatpush.bf16.msra.mxu1 %v1388_v30 }
  0x31   : > { %601 = vmatpush.bf16.msra.mxu2 %v1406_v31  ;;  %771 = vmatpush.bf16.msra.mxu3 %v1425_v63 }
  0x32   : > { %430 = vmatmul.bf16.vlgmr.msra.gmra.mxu0 %v1396_v34 }
  0x33   : > { %498 = vmatmul.bf16.vlgmr.msra.gmra.mxu1 %v1387_v35  ;;  %830 = vmatpush.bf16.msrb.mxu0 %v1421_v37  ;;  %v659_v37 = vld [vmem:[#allocation2 + $0x8] sm:$0x1] }
  0x34   : > { %602 = vmatmul.bf16.vlgmr.msra.gmra.mxu2 %v544_v36  ;;  %918 = vmatpush.bf16.msrb.mxu1 %v1437_v44 }
  0x35   : > { %1012 = vmatpush.bf16.msrb.mxu2 %v1446_v45  ;;  %772 = vmatpush.bf16.msra.mxu3 %v1424_v5 }
  0x37   : > { %831 = vmatpush.bf16.msrb.mxu0 %v1420_v38 }
  0x38   : > { %919 = vmatpush.bf16.msrb.mxu1 %v1436_v48 }
  0x39   : > { %1013 = vmatpush.bf16.msrb.mxu2 %v1445_v49  ;;  %773 = vmatpush.bf16.msra.mxu3 %v1423_v12 }
  0x3b   : > { %832 = vmatpush.bf16.msrb.mxu0 %v1419_v46 }
  0x3c   : > { %920 = vmatpush.bf16.msrb.mxu1 %v1435_v52 }
  0x3d   : > { %1014 = vmatpush.bf16.msrb.mxu2 %v1444_v53  ;;  %774 = vmatpush.bf16.msra.mxu3 %v1422_v16 }
  0x3f   : > { %833 = vmatpush.bf16.msrb.mxu0 %v1418_v50 }
  0x40   : > { %921 = vmatpush.bf16.msrb.mxu1 %v1434_v56 }
  0x41   : > { %1015 = vmatpush.bf16.msrb.mxu2 %v1443_v57 }
  0x43   : > { %834 = vmatpush.bf16.msrb.mxu0 %v1417_v54 }
  0x44   : > { %922 = vmatpush.bf16.msrb.mxu1 %v1433_v60 }
  0x45   : > { %1016 = vmatpush.bf16.msrb.mxu2 %v1442_v61 }
  0x47   : > { %835 = vmatpush.bf16.msrb.mxu0 %v1416_v58 }
  0x48   : > { %923 = vmatpush.bf16.msrb.mxu1 %v1432_v0 }
  0x49   : > { %1017 = vmatpush.bf16.msrb.mxu2 %v1441_v1  ;;  %v1502_v1 = vld [vmem:[%s1742_s4] ss:$0 sm:$0xff] }
  0x4b   : > { %836 = vmatpush.bf16.msrb.mxu0 %v1415_v62 }
  0x4c   : > { %924 = vmatpush.bf16.msrb.mxu1 %v1431_v8 }
  0x4d   : > { %1018 = vmatpush.bf16.msrb.mxu2 %v1440_v9  ;;  %v1503_v9 = vld [vmem:[%s1744_s6] ss:$0 sm:$0xff] }
  0x4f   : > { %837 = vmatpush.bf16.msrb.mxu0 %v1414_v4 }
  0x50   : > { %925 = vmatpush.bf16.msrb.mxu1 %v1430_v13 }
  0x51   : > { %1019 = vmatpush.bf16.msrb.mxu2 %v1439_v14 }
  0x54   : > { %1020 = vmatmul.bf16.vlgmr.msrb.gmra.mxu2 %v1438_v20 }
  0xaf   : > { %v431_v2 = vpop.f32.mrf.mxu0 }
  0xb0   : > { %v499_v3 = vpop.f32.mrf.mxu1 }
  0xb1   : > { %v500_v6 = vadd.f32 %v499_v3, %v431_v2 }
  0xb7   : > { %v603_v10 = vpop.f32.mrf.mxu2  ;;  %v433_v17 = vpop.f32.mrf.mxu0 }
  0xb8   : > { %v608_v11 = vadd.f32 %v603_v10, %v500_v6  ;;  %v501_v18 = vpop.f32.mrf.mxu1 }
  0xb9   : > { %v502_v22 = vadd.f32 %v501_v18, %v433_v17 }
  0xba   : > { %v614_v15 = vadd.f32 %v1501_v7, %v608_v11 }
  0xbc   : > { %v616_v19 = vmax.f32 %v614_v15, 0.0 }
  0xbe   : > { %v629_v21 = vpack.c.bf16 %v616_v19, %v616_v19 }
  0xbf   : > { %v605_v23 = vpop.f32.mrf.mxu2 }
  0xc0   : > { %v634_v24 = vshrl.u32 %v629_v21, 16  ;;  %v609_v25 = vadd.f32 %v605_v23, %v502_v22  ;;  %v637_v27 = vshll.u32 %v629_v21, 16 }
  0xc2   : > { %v636_v26 = vrot.slane %v634_v24, 7  ;;  %v615_v28 = vadd.f32 %v1501_v7, %v609_v25 }
  0xc4   : > { %v639_v30 = vor.u32 %v637_v27, %v636_v26  ;;  %v617_v31 = vmax.f32 %v615_v28, 0.0  ;;  %v640_v38 = vrot.slane %v636_v26, 4 }
  0xc6   : > { %v656_v32 = vsel %vm654_vm7, %v639_v30, %v655_v29  ;;  %v630_v33 = vpack.c.bf16 %v617_v31, %v617_v31 }
  0xc7   : > { %657 = vst [vmem:[#allocation2] sm:$0xf] %v656_v32 }
  0xc8   : > { %v642_v34 = vshrl.u32 %v630_v33, 16  ;;  %v645_v36 = vshll.u32 %v630_v33, 16 }
  0xca   : > { %v644_v35 = vrot.slane %v642_v34, 7 }
  0xcc   : > { %v647_v40 = vor.u32 %v645_v36, %v644_v35  ;;  %v649_v41 = vrot.slane %v644_v35, 4 }
  0xce   : > { %v648_v42 = vsel %vm632_vm9, %v640_v38, %v647_v40  ;;  %v660_v43 = vsel %vm1709_vm3, %v649_v41, %v659_v37  ;;  %v1457_v48 = vld [vmem:[#allocation2] sm:$0xe] }
  0xcf   : > { %658 = vst [vmem:[#allocation2 + $0x4] sm:$0xf] %v648_v42 }
  0xd0   : > { %661 = vst [vmem:[#allocation2 + $0x8] sm:$0x1] %v660_v43 }
  0xd6   : > { %v1448_v44 = vld [vmem:[#allocation2] sm:$0xff]  }
  0xd7   : > { %v1456_v45 = vld [vmem:[#allocation2] sm:$0xf0]  ;;  %v709_v46 = vshll.u32 %v1448_v44, 16  ;;  %838 = vmatmul.bf16.vlgmr.msrb.gmra.mxu0 %v1448_v44  ;;  %v680_v47 = vld [vmem:[#allocation2 + $0x8] sm:$0x1]  ;;  %v707_v53 = vshrl.u32 %v1448_v44, 16  ;;  %v1021_v2 = vpop.f32.mrf.mxu2 }
  0xd8   : > { %v703_v49 = vunpack.c.l.b16 %v680_v47  ;;  %v1458_v50 = vor.u32 %v1457_v48, %v1456_v45 }
  0xd9   : > { %v711_v51 = vrot.slane %v709_v46, 1 }
  0xda   : > { %v705_v52 = vpack.c.b16 %v703_v49, %v703_v49  ;;  %v866_v54 = vrot.slane %v1458_v50, 1 }
  0xdb   : > { %v712_v39 = vor.u32 %v711_v51, %v707_v53 }
  0xdc   : > { %v867_v55 = vrot.slane %v705_v52, 1  ;;  %v714_v56 = vshll.u32 %v705_v52, 16 }
  0xde   : > { %v868_v57 = vsel %vm865_vm10, %v866_v54, %v867_v55  ;;  %v716_v58 = vrot.slane %v714_v56, 1 }
  0xdf   : > { %926 = vmatmul.bf16.vlgmr.msrb.gmra.mxu1 %v868_v57  ;;  %v1023_v12 = vpop.f32.mrf.mxu2 }
  0xe0   : > { %v717_v59 = vsel %vm532_vm0, %v712_v39, %v716_v58 }
  0xe1   : > { %775 = vmatmul.bf16.vlgmr.msra.gmra.mxu3 %v717_v59 }
 0x154   : > { %v839_v60 = vpop.f32.mrf.mxu0 }
 0x15c   : > { %v927_v61 = vpop.f32.mrf.mxu1  ;;  %v841_v4 = vpop.f32.mrf.mxu0 }
 0x164   : > { %v776_v62 = vpop.f32.mrf.mxu3  ;;  %v929_v7 = vpop.f32.mrf.mxu1 }
 0x165   : > { %v840_v63 = vadd.f32 %v839_v60, %v776_v62 }
 0x167   : > { %v932_v0 = vadd.f32 %v927_v61, %v840_v63 }
 0x169   : > { %v938_v3 = vadd.f32 %v1502_v1, %v932_v0 }
 0x16b   : > { %v1026_v8 = vadd.f32 %v1021_v2, %v938_v3 }
 0x16c   : > { %v778_v5 = vpop.f32.mrf.mxu3 }
 0x16d   : > { %v842_v6 = vadd.f32 %v841_v4, %v778_v5  ;;  %v1032_v13 = vadd.f32 %v1503_v9, %v1026_v8 }
 0x16f   : > { %v933_v10 = vadd.f32 %v929_v7, %v842_v6  ;;  %v1034_v16 = vmax.f32 %v1032_v13, 0.0 }
 0x171   : > { %v939_v11 = vadd.f32 %v1502_v1, %v933_v10 }
 0x173   : > { %v1027_v14 = vadd.f32 %v1023_v12, %v939_v11 }
 0x175   : > { %v1033_v15 = vadd.f32 %v1503_v9, %v1027_v14 }
 0x177   : > { %v1035_v17 = vmax.f32 %v1033_v15, 0.0 }
 0x179   : > { %v1454_v18 = vpack.c.bf16 %v1035_v17, %v1034_v16 }
 0x17b   : > { %1455 = vst [vmem:[%s328_s13] sm:$0xff] %v1454_v18  }
 0x17c PF: > { %s19_s24 = sadd.s32 1, %s1608_s24  }
 0x17d   : > { %p16_p7 = scmp.ge.s32.totalorder %s19_s24, 4  }
 0x17f   :  { %18 = sbr.rel (!%p16_p7) target bundleno = 2 (0x2), region = 96 }
 0x184   :  { %1061 = vsyncpa [#allocation4], 1 }
 0x185   :  { %1063 = vsyncpa [#allocation4 + $0x1], 1 }
 0x186   :  { %1064 = vsyncpa [#allocation6], 1 }

</bundles_post_ra>
